<compile_context>
chip_gen: v6e
topology: v6e:2x2x1
jax: 0.10.0
libtpu: 0.0.40
codegen_flags: <defaults>
</compile_context>

<pallas_src>
import math
from functools import partial

import jax
import jax.numpy as jnp
from jax.experimental import pallas as pl
from jax.experimental.pallas import tpu as pltpu

# ---- constants for ver="3A", variable="lai" (NormBVNETNNV3A / DenormSNAPLAIV3A)
INPUT_MIN = jnp.array(
    [0.0, 0.0, 0.0, 0.008717364330310326, 0.019693160430621366,
     0.026217828282102625, 0.018931934894415213, 0.0,
     0.979624800125421, 0.342108564072183, -1.0],
    dtype=jnp.float32,
)
INPUT_MAX = jnp.array(
    [0.23901527463861838, 0.29172736471507876, 0.32652671459255694,
     0.5938903910368211, 0.7466909927207045, 0.7582393779705984,
     0.4929337190581187, 0.4877499217101771, 1.0,
     0.9274847491748729, 1.0],
    dtype=jnp.float32,
)
LAI_MIN = 0.00023377390882650673
LAI_MAX = 13.834592547008839

INPUT_SIZE = 11
HIDDEN_SIZE = 5

_LANE = 128      # vreg lane width
_SUBLANE = 8     # vreg sublane count (f32)


# ----------------------------------------------------------------------------
# Kernel: one pixel tile -> (1, tile) LAI tile. Normalize/denormalize folded.
# ----------------------------------------------------------------------------
def _bvnet_kernel(x_ref, w1_ref, b1_ref, w2_ref, b2_ref, o_ref, *, row_major):
    x = x_ref[...].astype(jnp.float32)

    if row_major:
        # x: (TM, 11) pixel-major rows. Contract the 11-feature dim of both
        # operands (A @ B^T form) so the result (5, TM) -- and therefore the
        # output store -- stays lane-dense. XLU/MXU cost is irrelevant here:
        # the kernel is HBM-read bound.
        h = jax.lax.dot_general(
            w1_ref[...], x, (((1,), (1,)), ((), ())),
            preferred_element_type=jnp.float32)                        # (5, TM)
    else:
        # x: (11, TN) feature-major: plain (5,11)@(11,TN) MXU matmul.
        h = jnp.dot(w1_ref[...], x, preferred_element_type=jnp.float32)  # (5, TN)

    h = jnp.tanh(h + b1_ref[...])                              # bias + tanh (VPU/EUP)
    y = jnp.sum(h * w2_ref[...], axis=0, keepdims=True)        # 5->1 on VPU + XLU
    o_ref[...] = y + b2_ref[...]                               # lane-dense (1, T) store


# ----------------------------------------------------------------------------
# Host-side parameter folding
#   x_norm = scale*x + shift  =>  W1' = W1*scale,  b1' = b1 + W1 @ shift
#   y = half*(W2 @ h + b2) + half + vmin  =>  W2' = half*W2, b2' = half*(b2+1)+vmin
# ----------------------------------------------------------------------------
def _fold_params(w1, b1, w2, b2,
                 input_min=INPUT_MIN, input_max=INPUT_MAX,
                 var_min=LAI_MIN, var_max=LAI_MAX):
    # NOTE: like the PyTorch reference, this divides by (max - min) unguarded;
    # all channel ranges are non-zero for ver=3A / lai.
    rng = input_max - input_min
    scale = 2.0 / rng                                  # (11,)
    shift = -(2.0 * input_min / rng + 1.0)             # (11,)

    w1p = (w1 * scale[None, :]).astype(jnp.float32)                       # (5, 11)
    b1p = (b1 + w1 @ shift).reshape(HIDDEN_SIZE, 1).astype(jnp.float32)   # (5, 1)

    half = 0.5 * (var_max - var_min)
    w2p = (half * w2).reshape(HIDDEN_SIZE, 1).astype(jnp.float32)         # (5, 1) == (half*W2)^T
    b2p = (half * (b2 + 1.0) + var_min).reshape(1, 1).astype(jnp.float32)  # (1, 1)
    return w1p, b1p, w2p, b2p


# ----------------------------------------------------------------------------
# Generation-aware tile / VMEM sizing
# ----------------------------------------------------------------------------
def _vmem_budget_bytes():
    """Per-core VMEM we allow Pallas to use (v7x has only 64 MiB/core)."""
    try:
        cap = pltpu.get_tpu_info().vmem_capacity_bytes
    except Exception:
        cap = 64 << 20                       # conservative: v7x per-core VMEM
    return int(min(cap * 3 // 4, 48 << 20))  # 48 MiB is plenty on v5e/v6e too


def _choose_tile(n, max_tile, *, bytes_per_px, budget, min_steps=4):
    """Lane-dense (multiple-of-128) pixel tile.

    - capped so the double-buffered VMEM blocks fit the per-chip budget,
    - >= min_steps grid steps (both v7x TensorCores busy, with room for each
      core to double-buffer) whenever that does not shrink the tile below a
      quarter of the request -- so tiny inputs on single-TC v5e/v6e don't pay
      extra per-step overhead.
    """
    n128 = pl.cdiv(n, _LANE) * _LANE
    cap = max(_LANE, budget // (2 * bytes_per_px) // _LANE * _LANE)
    req = max(_LANE, min(max_tile, cap) // _LANE * _LANE)
    tile = min(req, n128)
    if pl.cdiv(n128, tile) < min_steps:
        alt = pl.cdiv(pl.cdiv(n128, min_steps), _LANE) * _LANE
        if alt >= max(_LANE, req // 4):
            tile = alt
    return tile


# ----------------------------------------------------------------------------
# Core pallas_call wrapper.
#   row_major=True : x is (N, 11)  -> output (1, N)
#   row_major=False: x is (11, N)  -> output (1, N)
# No host-side pad/transpose; Pallas masks the boundary block (OOB lanes stay
# element-wise isolated and are never stored).
# ----------------------------------------------------------------------------
def _bvnet_pallas(x, w1p, b1p, w2p, b2p, *, row_major, tile_px):
    budget = _vmem_budget_bytes()
    if row_major:
        n, d = x.shape
        # VMEM bytes/pixel/buffer: (tile,11) block lane-padded 11->128,
        # (1,tile) output sublane-padded 1->8 (f32).
        bytes_per_px = (_LANE + _SUBLANE) * 4
        x_spec = pl.BlockSpec(
            lambda tile: (tile, INPUT_SIZE), lambda i: (i, 0)) if False else None
    else:
        d, n = x.shape
        # (11,tile) block sublane-padded 11->16, output padded 1->8.
        bytes_per_px = (2 * _SUBLANE + _SUBLANE) * 4
    assert d == INPUT_SIZE

    tile = _choose_tile(n, tile_px, bytes_per_px=bytes_per_px, budget=budget)
    grid = (pl.cdiv(n, tile),)

    if row_major:
        x_spec = pl.BlockSpec((tile, INPUT_SIZE), lambda i: (i, 0))
    else:
        x_spec = pl.BlockSpec((INPUT_SIZE, tile), lambda i: (0, i))
    const = lambda shape: pl.BlockSpec(shape, lambda i: (0, 0))

    out = pl.pallas_call(
        partial(_bvnet_kernel, row_major=row_major),
        out_shape=jax.ShapeDtypeStruct((1, n), jnp.float32),
        grid=grid,
        in_specs=[
            x_spec,                                   # pixel tile
            const((HIDDEN_SIZE, INPUT_SIZE)),         # W1' (5, 11)
            const((HIDDEN_SIZE, 1)),                  # b1' (5, 1)
            const((HIDDEN_SIZE, 1)),                  # W2'^T (5, 1)
            const((1, 1)),                            # b2' (1, 1)
        ],
        out_specs=pl.BlockSpec((1, tile), lambda i: (0, i)),   # lane-dense output
        compiler_params=pltpu.CompilerParams(
            dimension_semantics=("parallel",),
            vmem_limit_bytes=budget,
        ),
    )(x, w1p, b1p, w2p, b2p)
    return out                                        # (1, N)


# ----------------------------------------------------------------------------
# Public wrappers matching BVNET.forward
# ----------------------------------------------------------------------------
def bvnet_forward(s2_data, w1, b1, w2, b2, *, tile_px=8192):
    """Non-spatial forward: s2_data (N, 11) float32/bfloat16 -> (N, 1) float32.

    Reads (tile, 11) row blocks straight from HBM (no transpose, no pad); the
    output is produced lane-dense as (1, N) and reshaped (free) to (N, 1).
    """
    n, d = s2_data.shape
    assert d == INPUT_SIZE
    w1p, b1p, w2p, b2p = _fold_params(w1, b1, w2, b2)
    out = _bvnet_pallas(s2_data, w1p, b1p, w2p, b2p,
                        row_major=True, tile_px=tile_px)       # (1, N)
    return out.reshape(n, 1)


def bvnet_forward_spatial(s2_data_chw, w1, b1, w2, b2, *, tile_px=131072):
    """spatial_mode: s2_data_chw (C=11, H, W) -> (1, H, W). No transpose at all."""
    c, h, w = s2_data_chw.shape
    assert c == INPUT_SIZE
    w1p, b1p, w2p, b2p = _fold_params(w1, b1, w2, b2)
    out = _bvnet_pallas(s2_data_chw.reshape(c, h * w), w1p, b1p, w2p, b2p,
                        row_major=False, tile_px=tile_px)      # (1, H*W)
    return out.reshape(1, h, w)


# TODO(synk): BVNET.load_weights/set_snap_weights read CSV weight files from disk;
# weights are passed explicitly here instead (no file I/O in-kernel).


# ----------------------------------------------------------------------------
# Deterministic test harness
# ----------------------------------------------------------------------------
def _init_linear(key, out_features, in_features):
    """PyTorch-default-style init: U(-1/sqrt(fan_in), 1/sqrt(fan_in))."""
    kw, kb = jax.random.split(key)
    bound = 1.0 / math.sqrt(in_features)
    w = jax.random.uniform(kw, (out_features, in_features), jnp.float32,
                           minval=-bound, maxval=bound)
    b = jax.random.uniform(kb, (out_features,), jnp.float32,
                           minval=-bound, maxval=bound)
    return w, b


def _reference(s2_data, w1, b1, w2, b2):
    """Pure-JAX reference with the *unfolded* normalize / MLP / denormalize."""
    x_norm = 2.0 * (s2_data - INPUT_MIN) / (INPUT_MAX - INPUT_MIN) - 1.0
    h = jnp.tanh(x_norm @ w1.T + b1)
    y_norm = h @ w2.T + b2
    return 0.5 * (y_norm + 1.0) * (LAI_MAX - LAI_MIN) + LAI_MIN


if __name__ == "__main__":
    key = jax.random.PRNGKey(0)
    k_x, k_l1, k_l2 = jax.random.split(key, 3)

    # deterministic parameters (shapes from BVNET.__init__: 11 -> 5 -> 1)
    w1, b1 = _init_linear(k_l1, HIDDEN_SIZE, INPUT_SIZE)
    w2, b2 = _init_linear(k_l2, 1, HIDDEN_SIZE)

    # flat pixel-table input: 300 pixels (exercises the masked boundary block)
    n = 300
    u = jax.random.uniform(k_x, (n, INPUT_SIZE), jnp.float32)
    s2_data = INPUT_MIN + u * (INPUT_MAX - INPUT_MIN)

    out = jax.block_until_ready(bvnet_forward(s2_data, w1, b1, w2, b2))
    assert out.shape == (n, 1) and out.dtype == jnp.float32

    ref = _reference(s2_data, w1, b1, w2, b2)
    assert jnp.allclose(out, ref, atol=1e-3, rtol=1e-4), "mismatch vs JAX reference"

    # spatial_mode: (11, 16, 16) -> (1, 16, 16), no transpose anywhere
    s2_spatial = s2_data[: 16 * 16].reshape(16, 16, INPUT_SIZE).transpose(2, 0, 1)
    out_sp = jax.block_until_ready(
        bvnet_forward_spatial(s2_spatial, w1, b1, w2, b2))
    assert out_sp.shape == (1, 16, 16)
    ref_sp = _reference(s2_data[: 16 * 16], w1, b1, w2, b2).reshape(16, 16, 1)
    assert jnp.allclose(out_sp, jnp.transpose(ref_sp, (2, 0, 1)),
                        atol=1e-3, rtol=1e-4), "spatial mismatch vs JAX reference"

    print("KERNEL_OK")
</pallas_src>

<mosaic_0001>
module attributes {stable_mosaic.version = 11 : i64} {
  func.func @_bvnet_kernel(%arg0: i32, %arg1: memref<384x11xf32, #tpu.memory_space<vmem>>, %arg2: memref<5x11xf32, #tpu.memory_space<vmem>>, %arg3: memref<5x1xf32, #tpu.memory_space<vmem>>, %arg4: memref<5x1xf32, #tpu.memory_space<vmem>>, %arg5: memref<1x1xf32, #tpu.memory_space<vmem>>, %arg6: memref<1x384xf32, #tpu.memory_space<vmem>>) attributes {dimension_semantics = [#tpu.dimension_semantics<parallel>], iteration_bounds = array<i64: 1>, scalar_prefetch = 0 : i64, scratch_operands = 0 : i64, tpu.core_type = #tpu.core_type<tc>, window_params = [{transform_indices = @transform_0, window_bounds = array<i64: 384, 11>}, {pipeline_mode = #tpu.pipeline_mode<synchronous>, transform_indices = @transform_1, window_bounds = array<i64: 5, 11>}, {pipeline_mode = #tpu.pipeline_mode<synchronous>, transform_indices = @transform_2, window_bounds = array<i64: 5, 1>}, {pipeline_mode = #tpu.pipeline_mode<synchronous>, transform_indices = @transform_3, window_bounds = array<i64: 5, 1>}, {pipeline_mode = #tpu.pipeline_mode<synchronous>, transform_indices = @transform_4, window_bounds = array<i64: 1, 1>}, {transform_indices = @transform_5, window_bounds = array<i64: 1, 384>}]} {
    %c0 = arith.constant 0 : index
    %c0_0 = arith.constant 0 : index
    %0 = vector.load %arg1[%c0, %c0_0] : memref<384x11xf32, #tpu.memory_space<vmem>>, vector<384x11xf32>
    %c0_1 = arith.constant 0 : index
    %c0_2 = arith.constant 0 : index
    %1 = vector.load %arg2[%c0_1, %c0_2] : memref<5x11xf32, #tpu.memory_space<vmem>>, vector<5x11xf32>
    %cst = arith.constant dense<0.000000e+00> : vector<5x384xf32>
    %2 = tpu.matmul %1, %0, %cst {dimension_numbers = #tpu.dot_dimension_numbers<[1], [1], [0], [0], [0, 0, 1, 0], [], []>} : vector<5x11xf32>, vector<384x11xf32>, vector<5x384xf32> -> vector<5x384xf32>
    %c0_3 = arith.constant 0 : index
    %c0_4 = arith.constant 0 : index
    %3 = vector.load %arg3[%c0_3, %c0_4] : memref<5x1xf32, #tpu.memory_space<vmem>>, vector<5x1xf32>
    %4 = vector.broadcast %3 : vector<5x1xf32> to vector<5x384xf32>
    %5 = arith.addf %2, %4 : vector<5x384xf32>
    %6 = math.tanh %5 : vector<5x384xf32>
    %c0_5 = arith.constant 0 : index
    %c0_6 = arith.constant 0 : index
    %7 = vector.load %arg4[%c0_5, %c0_6] : memref<5x1xf32, #tpu.memory_space<vmem>>, vector<5x1xf32>
    %8 = vector.broadcast %7 : vector<5x1xf32> to vector<5x384xf32>
    %9 = arith.mulf %6, %8 : vector<5x384xf32>
    %cst_7 = arith.constant dense<0.000000e+00> : vector<384xf32>
    %10 = vector.multi_reduction <add>, %9, %cst_7 [0] : vector<5x384xf32> to vector<384xf32>
    %11 = vector.shape_cast %10 : vector<384xf32> to vector<1x384xf32>
    %c0_8 = arith.constant 0 : index
    %c0_9 = arith.constant 0 : index
    %12 = vector.load %arg5[%c0_8, %c0_9] : memref<1x1xf32, #tpu.memory_space<vmem>>, vector<1x1xf32>
    %13 = vector.broadcast %12 : vector<1x1xf32> to vector<1x384xf32>
    %14 = arith.addf %11, %13 : vector<1x384xf32>
    %c0_10 = arith.constant 0 : index
    %c0_11 = arith.constant 0 : index
    %15 = vector.load %arg6[%c0_10, %c0_11] : memref<1x384xf32, #tpu.memory_space<vmem>>, vector<1x384xf32>
    tpu.vector_store %arg6[%c0_10, %c0_11], %14 {strides = array<i32>} : memref<1x384xf32, #tpu.memory_space<vmem>>, vector<1x384xf32>,
    return
  }
  func.func @transform_0(%arg0: i32) -> (i32, i32) {
    %c0_i32 = arith.constant 0 : i32
    %c0_i32_0 = arith.constant 0 : i32
    return %arg0, %c0_i32 : i32, i32
  }
  func.func @transform_1(%arg0: i32) -> (i32, i32) {
    %c0_i32 = arith.constant 0 : i32
    %c0_i32_0 = arith.constant 0 : i32
    %c0_i32_1 = arith.constant 0 : i32
    return %c0_i32, %c0_i32_0 : i32, i32
  }
  func.func @transform_2(%arg0: i32) -> (i32, i32) {
    %c0_i32 = arith.constant 0 : i32
    %c0_i32_0 = arith.constant 0 : i32
    %c0_i32_1 = arith.constant 0 : i32
    return %c0_i32, %c0_i32_0 : i32, i32
  }
  func.func @transform_3(%arg0: i32) -> (i32, i32) {
    %c0_i32 = arith.constant 0 : i32
    %c0_i32_0 = arith.constant 0 : i32
    %c0_i32_1 = arith.constant 0 : i32
    return %c0_i32, %c0_i32_0 : i32, i32
  }
  func.func @transform_4(%arg0: i32) -> (i32, i32) {
    %c0_i32 = arith.constant 0 : i32
    %c0_i32_0 = arith.constant 0 : i32
    %c0_i32_1 = arith.constant 0 : i32
    return %c0_i32, %c0_i32_0 : i32, i32
  }
  func.func @transform_5(%arg0: i32) -> (i32, i32) {
    %c0_i32 = arith.constant 0 : i32
    %c0_i32_0 = arith.constant 0 : i32
    return %c0_i32, %arg0 : i32, i32
  }
}

</mosaic_0001>

<bundles_post_ra>
// kernel: tpu_custom_call.1
= control target key start
LH: loop header
LB: loop body
LE: loop exit
PB: predicated region body
PF: predicated region fallthrough
CT: control target
= control target key end

     0   :  { %s898_s0 = inlined_call_operand.vmem [shape: f32[300,11], index: 0, kind: input, shape index: {}]   ;;  %s899_s1 = inlined_call_operand.vmem [shape: f32[5,11], index: 1, kind: input, shape index: {}]   ;;  %s900_s2 = inlined_call_operand.vmem [shape: f32[5,1], index: 2, kind: input, shape index: {}]   ;;  %s901_s3 = inlined_call_operand.vmem [shape: f32[5,1], index: 3, kind: input, shape index: {}]   ;;  %s902_s4 = inlined_call_operand.<no memory space> [shape: f32[1,1], index: 4, kind: input, shape index: {}]   ;;  %s903_s5 = inlined_call_operand.hbm [shape: f32[1,300], index: 5, kind: output, shape index: {}]  }
   0x1   :  { %v10_v0 = vstv %s902_s4 }
   0x2   :  { %11 = vst [vmem:[#allocation2] sm:$0x1] %v10_v0 }
   0x3   :  { %v54_v1 = vld [vmem:[%s898_s0 + $0xf8] sm:$0xff]  ;;  %vm78_vm0 = vcmask 89088   ;;  %v631_v4 = vmov 0.0   ;;  %v53_v5 = vld [vmem:[%s898_s0 + $0xf0] sm:$0xff]  ;;  %v52_v8 = vld [vmem:[%s898_s0 + $0xe8] sm:$0xff]  ;;  %vm632_vm1 = vmmov 0  }
   0x4   :  { %v38_v2 = vld [vmem:[%s898_s0 + $0x78] sm:$0xff]  ;;  %510 = vmatprep.subr.msk.mxu0 %vm78_vm0, %v54_v1  ;;  %561 = vmatprep.subr.mxu1 %v631_v4  ;;  %v37_v6 = vld [vmem:[%s898_s0 + $0x70] sm:$0xff]  ;;  %v633_v9 = vmov 0   ;;  %v36_v10 = vld [vmem:[%s898_s0 + $0x68] sm:$0xff] }
   0x5   :  { %v70_v3 = vld [vmem:[%s898_s0 + $0x178] sm:$0xff]  ;;  %511 = vmatpush3.xpose.msk.msra.mxu0 %vm78_vm0, %v38_v2  ;;  %v69_v7 = vld [vmem:[%s898_s0 + $0x170] sm:$0xff]  ;;  %593 = vmatprep.mubr.msk.f32.mxu1 %vm632_vm1, %v631_v4  ;;  %v68_v11 = vld [vmem:[%s898_s0 + $0x168] sm:$0xff] }
   0x6   :  { %562 = vmatpush3.xpose.msk.msra.mxu1 %vm78_vm0, %v70_v3  ;;  %512 = vmatprep.subr.msk.mxu0 %vm78_vm0, %v53_v5  ;;  %v51_v12 = vld [vmem:[%s898_s0 + $0xe0] sm:$0xff]  ;;  %v50_v15 = vld [vmem:[%s898_s0 + $0xd8] sm:$0xff]  ;;  %v49_v18 = vld [vmem:[%s898_s0 + $0xd0] sm:$0xff] }
   0x7   :  { %563 = vmatprep.subr.mxu1 %v631_v4  ;;  %601 = vset.pattern.permute.xlu0 %v633_v9  ;;  %v35_v13 = vld [vmem:[%s898_s0 + $0x60] sm:$0xff]  ;;  %v34_v16 = vld [vmem:[%s898_s0 + $0x58] sm:$0xff] }
   0x8   :  { %602 = vset.pattern.permute.xlu1 %v633_v9  ;;  %v67_v14 = vld [vmem:[%s898_s0 + $0x160] sm:$0xff]  ;;  %v66_v17 = vld [vmem:[%s898_s0 + $0x158] sm:$0xff] }
   0x9   :  { %513 = vmatpush3.xpose.msk.msra.mxu0 %vm78_vm0, %v37_v6  ;;  %v739_v19 = vld [vmem:[%s899_s1] sm:$0x1f] }
   0xa   :  { %564 = vmatpush3.xpose.msk.msra.mxu1 %vm78_vm0, %v69_v7  ;;  %514 = vmatprep.subr.msk.mxu0 %vm78_vm0, %v52_v8  ;;  %v72_v20 = vld [vmem:[%s900_s2] sm:$0x1f] }
   0xb   :  { %565 = vmatprep.subr.mxu1 %v631_v4  ;;  %542 = vmatprep.mubr.msk.f32.mxu0 %vm78_vm0, %v739_v19  ;;  %v401_v21 = vld [vmem:[#allocation2] sm:$0x1] }
   0xc   :  { %75 = vperm.xlu0 %601, %v72_v20  }
   0xd   :  { %515 = vmatpush3.xpose.msk.msra.mxu0 %vm78_vm0, %v36_v10 }
   0xe   :  { %566 = vmatpush3.xpose.msk.msra.mxu1 %vm78_vm0, %v68_v11  ;;  %516 = vmatprep.subr.msk.mxu0 %vm78_vm0, %v51_v12 }
   0xf   :  { %567 = vmatprep.subr.mxu1 %v631_v4 }
  0x11   :  { %517 = vmatpush3.xpose.msk.msra.mxu0 %vm78_vm0, %v35_v13 }
  0x12   :  { %568 = vmatpush3.xpose.msk.msra.mxu1 %vm78_vm0, %v67_v14  ;;  %518 = vmatprep.subr.msk.mxu0 %vm78_vm0, %v50_v15 }
  0x13   :  { %569 = vmatprep.subr.mxu1 %v631_v4 }
  0x14   :  { %12 = vsyncpa [#allocation4], 0  ;;  %v370_v22 = vld [vmem:[%s901_s3] sm:$0x1f]  ;;  %v33_v23 = vld [vmem:[%s898_s0 + $0x50] sm:$0xff]  ;;  %404 = vperm.xlu1 %602, %v401_v21   ;;  %vm379_vm2 = vcmask 1044480   ;;  %v407_v5 = vlaneseq }
  0x15   :  { %519 = vmatpush3.xpose.msk.msra.mxu0 %vm78_vm0, %v34_v16  ;;  %v65_v24 = vld [vmem:[%s898_s0 + $0x150] sm:$0xff]  ;;  %v48_v25 = vld [vmem:[%s898_s0 + $0xc8] sm:$0xff]  ;;  %373 = vperm.xlu0 %601, %v370_v22   ;;  %v47_v28 = vld [vmem:[%s898_s0 + $0xc0] sm:$0xff]  ;;  %v634_v21 = vmov 1966171168  }
  0x16   :  { %570 = vmatpush3.xpose.msk.msra.mxu1 %vm78_vm0, %v66_v17  ;;  %520 = vmatprep.subr.msk.mxu0 %vm78_vm0, %v49_v18  ;;  %v32_v26 = vld [vmem:[%s898_s0 + $0x48] sm:$0xff]  ;;  %v31_v29 = vld [vmem:[%s898_s0 + $0x40] sm:$0xff]  ;;  %v46_v31 = vld [vmem:[%s898_s0 + $0xb8] sm:$0xff]  ;;  %v408_v13 = vshrl.u32 %v407_v5, 7  ;;  %v419_v22 = vunpack.c.l.s4 %v634_v21  ;;  %vm443_vm3 = vcmp.lt.s32.totalorder %v407_v5, 384 }
  0x17   :  { %571 = vmatprep.subr.mxu1 %v631_v4  ;;  %v64_v27 = vld [vmem:[%s898_s0 + $0x148] sm:$0xff]  ;;  %v63_v30 = vld [vmem:[%s898_s0 + $0x140] sm:$0xff]  ;;  %v30_v32 = vld [vmem:[%s898_s0 + $0x38] sm:$0xff] }
  0x18   :  { %v62_v33 = vld [vmem:[%s898_s0 + $0x138] sm:$0xff]  ;;  %v45_v34 = vld [vmem:[%s898_s0 + $0xb0] sm:$0xff]  ;;  %v44_v37 = vld [vmem:[%s898_s0 + $0xa8] sm:$0xff]  ;;  %v409_v20 = vsub.s32 0, %v408_v13 }
  0x19   :  { %521 = vmatpush3.xpose.msk.msra.mxu0 %vm78_vm0, %v33_v23  ;;  %v29_v35 = vld [vmem:[%s898_s0 + $0x30] sm:$0xff]  ;;  %v28_v38 = vld [vmem:[%s898_s0 + $0x28] sm:$0xff]  ;;  %v43_v40 = vld [vmem:[%s898_s0 + $0xa0] sm:$0xff] }
  0x1a   :  { %572 = vmatpush3.xpose.msk.msra.mxu1 %vm78_vm0, %v65_v24  ;;  %522 = vmatprep.subr.msk.mxu0 %vm78_vm0, %v48_v25  ;;  %v61_v36 = vld [vmem:[%s898_s0 + $0x130] sm:$0xff]  ;;  %v60_v39 = vld [vmem:[%s898_s0 + $0x128] sm:$0xff]  ;;  %v27_v41 = vld [vmem:[%s898_s0 + $0x20] sm:$0xff] }
  0x1b   :  { %573 = vmatprep.subr.mxu1 %v631_v4  ;;  %v59_v42 = vld [vmem:[%s898_s0 + $0x120] sm:$0xff]  ;;  %v42_v43 = vld [vmem:[%s898_s0 + $0x98] sm:$0xff]  ;;  %v41_v46 = vld [vmem:[%s898_s0 + $0x90] sm:$0xff] }
  0x1c   :  { %v26_v44 = vld [vmem:[%s898_s0 + $0x18] sm:$0xff]  ;;  %v25_v47 = vld [vmem:[%s898_s0 + $0x10] sm:$0xff]  ;;  %v40_v49 = vld [vmem:[%s898_s0 + $0x88] sm:$0xff] }
  0x1d   :  { %523 = vmatpush3.xpose.msk.msra.mxu0 %vm78_vm0, %v32_v26  ;;  %v58_v45 = vld [vmem:[%s898_s0 + $0x118] sm:$0xff]  ;;  %v57_v48 = vld [vmem:[%s898_s0 + $0x110] sm:$0xff]  ;;  %v24_v50 = vld [vmem:[%s898_s0 + $0x8] sm:$0xff] }
  0x1e   :  { %574 = vmatpush3.xpose.msk.msra.mxu1 %vm78_vm0, %v64_v27  ;;  %524 = vmatprep.subr.msk.mxu0 %vm78_vm0, %v47_v28  ;;  %v56_v51 = vld [vmem:[%s898_s0 + $0x108] sm:$0xff]  ;;  %v39_v52 = vld [vmem:[%s898_s0 + $0x80] sm:$0xff] }
  0x1f   :  { %575 = vmatprep.subr.mxu1 %v631_v4  ;;  %v23_v53 = vld [vmem:[%s898_s0] sm:$0xff] }
  0x20   :  { %v55_v54 = vld [vmem:[%s898_s0 + $0x100] sm:$0xff]  ;;  %s635_s0 = smov [#allocation3]  }
  0x21   :  { %525 = vmatpush3.xpose.msk.msra.mxu0 %vm78_vm0, %v31_v29  ;;  %v420_v29 = vunpack.c.0.s8 %v419_v22  ;;  %s452_s3 = sshll.u32 %s635_s0, 4  ;;  %s453_s3 = int_to_ptr.vmem [resolvable:$true] %s452_s3 }
  0x22   :  { %576 = vmatpush3.xpose.msk.msra.mxu1 %vm78_vm0, %v63_v30  ;;  %526 = vmatprep.subr.msk.mxu0 %vm78_vm0, %v46_v31  ;;  %s609_s10 = scalar_lea.vmem %s453_s3, 48  ;;  %s613_s11 = scalar_lea.vmem %s453_s3, 64 }
  0x23   :  { %577 = vmatprep.subr.mxu1 %v631_v4  ;;  %p610_p0 = scmp.ne.s32.totalorder %s453_s3, %s609_s10  ;;  %p614_p1 = scmp.lt.s32.totalorder %s453_s3, %s453_s3 }
  0x24   :  { %p615_p2 = scmp.lt.s32.totalorder %s613_s11, %s609_s10 }
  0x25   :  { %527 = vmatpush3.xpose.msk.msra.mxu0 %vm78_vm0, %v30_v32 }
  0x26   :  { %578 = vmatpush3.xpose.msk.msra.mxu1 %vm78_vm0, %v62_v33  ;;  %528 = vmatprep.subr.msk.mxu0 %vm78_vm0, %v45_v34  ;;  %p616_p3 = por %p615_p2, %p614_p1 }
  0x27   :  { %579 = vmatprep.subr.mxu1 %v631_v4 }
  0x28   :  { %p617_p4 = pnand %p616_p3, %p610_p0 }
  0x29   :  { %529 = vmatpush3.xpose.msk.msra.mxu0 %vm78_vm0, %v29_v35  ;;  %v423_v35 = vsub.s32 %v420_v29, %v408_v13 }
  0x2a   :  { %580 = vmatpush3.xpose.msk.msra.mxu1 %vm78_vm0, %v61_v36  ;;  %530 = vmatprep.subr.msk.mxu0 %vm78_vm0, %v44_v37 }
  0x2b   :  { %581 = vmatprep.subr.mxu1 %v631_v4 }
  0x2d   :  { %531 = vmatpush3.xpose.msk.msra.mxu0 %vm78_vm0, %v28_v38 }
  0x2e   :  { %582 = vmatpush3.xpose.msk.msra.mxu1 %vm78_vm0, %v60_v39  ;;  %532 = vmatprep.subr.msk.mxu0 %vm78_vm0, %v43_v40 }
  0x2f   :  { %583 = vmatprep.subr.mxu1 %v631_v4 }
  0x31   :  { %533 = vmatpush3.xpose.msk.msra.mxu0 %vm78_vm0, %v27_v41 }
  0x32   :  { %584 = vmatpush3.xpose.msk.msra.mxu1 %vm78_vm0, %v59_v42  ;;  %534 = vmatprep.subr.msk.mxu0 %vm78_vm0, %v42_v43 }
  0x33   :  { %585 = vmatprep.subr.mxu1 %v631_v4 }
  0x35   :  { %535 = vmatpush3.xpose.msk.msra.mxu0 %vm78_vm0, %v26_v44 }
  0x36   :  { %586 = vmatpush3.xpose.msk.msra.mxu1 %vm78_vm0, %v58_v45  ;;  %536 = vmatprep.subr.msk.mxu0 %vm78_vm0, %v41_v46 }
  0x37   :  { %587 = vmatprep.subr.mxu1 %v631_v4 }
  0x39   :  { %537 = vmatpush3.xpose.msk.msra.mxu0 %vm78_vm0, %v25_v47 }
  0x3a   :  { %588 = vmatpush3.xpose.msk.msra.mxu1 %vm78_vm0, %v57_v48  ;;  %538 = vmatprep.subr.msk.mxu0 %vm78_vm0, %v40_v49 }
  0x3b   :  { %589 = vmatprep.subr.mxu1 %v631_v4 }
  0x3d   :  { %539 = vmatpush3.xpose.msk.msra.mxu0 %vm78_vm0, %v24_v50 }
  0x3e   :  { %590 = vmatpush3.xpose.msk.msra.mxu1 %vm78_vm0, %v56_v51  ;;  %540 = vmatprep.subr.msk.mxu0 %vm78_vm0, %v39_v52 }
  0x3f   :  { %591 = vmatprep.subr.mxu1 %v631_v4 }
  0x41   :  { %541 = vmatpush3.xpose.msk.msra.mxu0 %vm78_vm0, %v23_v53 }
  0x42   :  { %592 = vmatpush3.xpose.msk.msra.mxu1 %vm78_vm0, %v55_v54 }
  0x44   :  { %543 = vmatmul.mubr.msk.f32.vlgmr.msra.gmra.mxu0 %vm78_vm0, %v739_v19 }
  0x45   :  { %594 = vmatmul.mubr.msk.f32.vlgmr.msra.gmra.mxu1 %vm78_vm0, %v739_v19 }
  0x87   :  { %v76_v55 = vpop.permute.xlu0 %75 }
  0x8f   :  { %v405_v25 = vpop.permute.xlu1 %404 }
  0x90   :  { %v374_v0 = vpop.permute.xlu0 %373  ;;  %v410_v32 = vrot.slane %v405_v25, %v409_v20 }
 0x104   :  { %v292_v56 = vpop.f32.mrf.mxu0 }
 0x105   :  { %v363_v57 = vpop.f32.mrf.mxu1  ;;  %v293_v58 = vadd.f32 %v292_v56, %v76_v55 }
 0x106   :  { %v364_v59 = vadd.f32 %v363_v57, %v76_v55  ;;  %v294_v60 = vpop.f32.mrf.mxu0 }
 0x107   :  { %v595_v61 = vpop.f32.mrf.mxu1  ;;  %603 = vtanh.f32 %v293_v58  ;;  %v295_v62 = vadd.f32 %v294_v60, %v76_v55 }
 0x108   :  { %605 = vtanh.f32 %v364_v59 }
 0x109   :  { %607 = vtanh.f32 %v295_v62 }
 0x114   :  { %v604_v63 = vpop.eup %603 }
 0x115   :  { %v606_v1 = vpop.eup %605  ;;  %v376_v2 = vmul.f32 %v604_v63, %v374_v0 }
 0x116   :  { %v608_v3 = vpop.eup %607  ;;  %v378_v4 = vmul.f32 %v606_v1, %v374_v0 }
 0x117   :  { %v380_v6 = vsel %vm379_vm2, %v376_v2, 0.0  ;;  %v377_v7 = vmul.f32 %v608_v3, %v374_v0 }
 0x118   :  { %v381_v8 = vrot.slane %v380_v6, 4  ;;  %v394_v9 = vsel %vm379_vm2, %v378_v4, 0.0 }
 0x119   :  { %v395_v10 = vrot.slane %v394_v9, 4  ;;  %v387_v11 = vsel %vm379_vm2, %v377_v7, 0.0 }
 0x11a   :  { %v382_v12 = vadd.f32 %v381_v8, %v380_v6  ;;  %v388_v14 = vrot.slane %v387_v11, 4 }
 0x11b   :  { %v396_v15 = vadd.f32 %v395_v10, %v394_v9 }
 0x11c   :  { %v383_v16 = vrot.slane %v382_v12, 2  ;;  %v389_v17 = vadd.f32 %v388_v14, %v387_v11 }
 0x11d   :  { %v397_v18 = vrot.slane %v396_v15, 2 }
 0x11e   :  { %v384_v19 = vadd.f32 %v383_v16, %v382_v12  ;;  %v390_v23 = vrot.slane %v389_v17, 2 }
 0x11f   :  { %v398_v24 = vadd.f32 %v397_v18, %v396_v15 }
 0x120   :  { %v385_v26 = vrot.slane %v384_v19, 1  ;;  %v391_v27 = vadd.f32 %v390_v23, %v389_v17 }
 0x121   :  { %v399_v28 = vrot.slane %v398_v24, 1 }
 0x122   :  { %v386_v30 = vadd.f32 %v385_v26, %v384_v19  ;;  %v392_v31 = vrot.slane %v391_v27, 1 }
 0x123   :  { %v400_v33 = vadd.f32 %v399_v28, %v398_v24 }
 0x124   :  { %v393_v34 = vadd.f32 %v392_v31, %v391_v27  ;;  %v411_v36 = vadd.f32 %v410_v32, %v386_v30 }
 0x125   :  { %v413_v38 = vadd.f32 %v410_v32, %v400_v33 }
 0x126   :  { %v412_v37 = vadd.f32 %v410_v32, %v393_v34 }
 0x127   :  { %v431_v40 = vrot.slane %v413_v38, %v423_v35 }
 0x128   :  { %v417_v39 = vcombine.low %v411_v36, %v412_v37 }
 0x12a   :  { %v424_v41 = vrot.slane %v417_v39, %v423_v35 }
 0x12c   :  { %v432_v42 = vcombine.low %v424_v41, %v431_v40 }
 0x12e   :  { %v439_v43 = vrot.slane %v432_v42, %v423_v35 }
 0x130   :  { %445 = vst.msk [vmem:[#allocation3] sm:$0x7] %vm443_vm3, %v439_v43 }
 0x131   :  { %620 = shalt.err (!%p617_p4)
}
 0x132   :  { %455 = dma.vmem_to_hbm [thread:$0]  %s453_s3, 48, %s903_s5, [#allocation4]  }
 0x133   :  { %629 = dma.done.wait [#allocation4], 48  }
 0x134   :  { %630 = vsyncadd [#allocation4], 4294967248 }
 0x135   :  { %459 = vsyncpa [#allocation4], 1 }

</bundles_post_ra>
